<compile_context>
chip_gen: v7x
topology: tpu7x:2x2x1
jax: 0.10.0
libtpu: 0.0.40
codegen_flags: <defaults>
</compile_context>

<pallas_src>
import numpy as np
import jax
import jax.numpy as jnp
from jax.experimental import pallas as pl
from jax.experimental.pallas import tpu as pltpu

EPS = 1e-6          # T5 layer_norm_epsilon
NEG_INF = -1e9      # additive mask value


# --------------------------------------------------------------------------
# Kernel 1: token-embedding gather (per-row DMA, ids scalar-prefetched)
# --------------------------------------------------------------------------

def _embed_gather_kernel(ids_ref, table_ref, out_ref, buf_ref, sem):
    """Gather embedding rows table[ids[i]] -> out[i] with async HBM DMAs."""
    n_rows = out_ref.shape[0]

    def _start(i, c):
        pltpu.make_async_copy(table_ref.at[ids_ref[i]], buf_ref.at[i],
                              sem).start()
        return c

    def _wait(i, c):
        pltpu.make_async_copy(table_ref.at[ids_ref[i]], buf_ref.at[i],
                              sem).wait()
        return c

    jax.lax.fori_loop(0, n_rows, _start, 0)   # issue all row DMAs (overlap)
    jax.lax.fori_loop(0, n_rows, _wait, 0)    # drain
    out_ref[...] = buf_ref[...]


def _embed_rows(input_ids, table):
    """Returns the gathered embeddings, flattened to (B*S, D)."""
    B, S = input_ids.shape
    V, D = table.shape
    BS = B * S
    ids = input_ids.reshape(BS).astype(jnp.int32)
    return pl.pallas_call(
        _embed_gather_kernel,
        out_shape=jax.ShapeDtypeStruct((BS, D), jnp.float32),
        grid_spec=pltpu.PrefetchScalarGridSpec(
            num_scalar_prefetch=1,
            grid=(1,),
            in_specs=[pl.BlockSpec(memory_space=pl.ANY)],     # table stays in HBM
            out_specs=pl.BlockSpec((BS, D), lambda i, ids: (0, 0)),
            scratch_shapes=[pltpu.VMEM((BS, D), jnp.float32),
                            pltpu.SemaphoreType.DMA],
        ),
    )(ids, table)


# --------------------------------------------------------------------------
# Kernel 2: fused encoder stack (grid over layers, hidden resident in VMEM)
# --------------------------------------------------------------------------

def _make_encoder_kernel(max_distance):
    def kernel(emb_ref, mask_ref, rel_ref, lnf_ref,
               ln1_ref, wqkv_ref, wo_ref, ln2_ref, wi_ref, wof_ref,
               out_ref, pb_ref, ctx_ref):
        layer = pl.program_id(0)
        n_layers = pl.num_programs(0)
        BS, D = out_ref.shape
        B, S = mask_ref.shape
        H, NB = rel_ref.shape
        inner = wo_ref.shape[1]
        dh = inner // H

        # ---- one-time init at layer 0: load hidden, build position bias ----
        @pl.when(layer == 0)
        def _init():
            out_ref[...] = emb_ref[...]
            # T5 bidirectional relative-position bucketing, done on the VPU/EUP.
            half = NB // 2
            max_exact = half // 2
            qpos = jax.lax.broadcasted_iota(jnp.int32, (S, S, NB), 0)
            kpos = jax.lax.broadcasted_iota(jnp.int32, (S, S, NB), 1)
            nbit = jax.lax.broadcasted_iota(jnp.int32, (S, S, NB), 2)
            rel = kpos - qpos                       # memory - context
            n = jnp.abs(rel)
            nf = jnp.maximum(n, 1).astype(jnp.float32)
            large = max_exact + (
                jnp.log(nf * (1.0 / max_exact))
                * ((half - max_exact) / np.log(max_distance / max_exact))
            ).astype(jnp.int32)
            large = jnp.minimum(large, half - 1)
            bucket = (jnp.where(rel > 0, half, 0)
                      + jnp.where(n < max_exact, n, large))
            onehot = (bucket == nbit).astype(jnp.float32)       # (S, S, NB)
            for h in range(H):
                row = rel_ref[h:h + 1, :][None]                 # (1, 1, NB)
                pb_ref[h] = jnp.sum(onehot * row, axis=-1)      # (S, S)

        # ------------------- self-attention sublayer ------------------------
        x = out_ref[...]                                         # (BS, D) f32
        var = jnp.mean(x * x, axis=-1, keepdims=True)
        xn = x * jax.lax.rsqrt(var + EPS) * ln1_ref[0]           # RMSNorm

        # single coalesced QKV projection (bf16 MXU operands, f32 acc)
        qkv = jnp.dot(xn.astype(jnp.bfloat16), wqkv_ref[0],
                      preferred_element_type=jnp.float32)        # (BS, 3*inner)
        qkv = qkv.astype(jnp.bfloat16)
        mask = mask_ref[...]                                     # (B, S) f32

        # TODO(synk): for many heads / long S, switch to
        # lax.fori_loop(unroll=True) and tile the kv axis to bound vregs.
        for b in range(B):
            r0 = b * S
            key_bias = (1.0 - mask[b:b + 1, :]) * NEG_INF        # (1, S)
            for h in range(H):
                c0 = h * dh
                qh = qkv[r0:r0 + S, c0:c0 + dh]
                kh = qkv[r0:r0 + S, inner + c0:inner + c0 + dh]
                vh = qkv[r0:r0 + S, 2 * inner + c0:2 * inner + c0 + dh]
                # T5 does NOT scale scores by 1/sqrt(d_head)
                scores = jax.lax.dot_general(
                    qh, kh, (((1,), (1,)), ((), ())),
                    preferred_element_type=jnp.float32)          # (S, S) f32
                scores = scores + pb_ref[h] + key_bias
                scores = scores - jnp.max(scores, axis=-1, keepdims=True)
                p = jnp.exp(scores)
                p = p * pl.reciprocal(jnp.sum(p, axis=-1, keepdims=True),
                                      approx=True)
                ctx_ref[r0:r0 + S, c0:c0 + dh] = jnp.dot(
                    p.astype(jnp.bfloat16), vh,
                    preferred_element_type=jnp.float32)          # (S, dh)

        # single full-K output projection over the concatenated heads
        attn = jnp.dot(ctx_ref[...].astype(jnp.bfloat16), wo_ref[0],
                       preferred_element_type=jnp.float32)       # (BS, D)
        out_ref[...] = x + attn

        # ----------------------- feed-forward sublayer ----------------------
        x = out_ref[...]
        var = jnp.mean(x * x, axis=-1, keepdims=True)
        xn = x * jax.lax.rsqrt(var + EPS) * ln2_ref[0]
        h_mid = jnp.maximum(
            jnp.dot(xn.astype(jnp.bfloat16), wi_ref[0],
                    preferred_element_type=jnp.float32), 0.0)
        out_ref[...] = x + jnp.dot(h_mid.astype(jnp.bfloat16), wof_ref[0],
                                   preferred_element_type=jnp.float32)

        # ----------------- final RMSNorm after the last layer ---------------
        @pl.when(layer == n_layers - 1)
        def _final():
            hfin = out_ref[...]
            var_f = jnp.mean(hfin * hfin, axis=-1, keepdims=True)
            out_ref[...] = hfin * jax.lax.rsqrt(var_f + EPS) * lnf_ref[...]

    return kernel


def _encoder_stack(emb_flat, mask_f, rel_t, lnf,
                   ln1_all, wqkv_all, wo_all, ln2_all, wi_all, wof_all,
                   max_distance):
    BS, D = emb_flat.shape
    B, S = mask_f.shape
    H, NB = rel_t.shape
    L = ln1_all.shape[0]
    inner = wo_all.shape[1]
    F = wi_all.shape[2]
    kernel = _make_encoder_kernel(max_distance)
    return pl.pallas_call(
        kernel,
        out_shape=jax.ShapeDtypeStruct((BS, D), jnp.float32),
        grid=(L,),
        in_specs=[
            pl.BlockSpec((BS, D), lambda l: (0, 0)),              # embeddings
            pl.BlockSpec((B, S), lambda l: (0, 0)),               # attention mask
            pl.BlockSpec((H, NB), lambda l: (0, 0)),              # rel-bias table
            pl.BlockSpec((1, D), lambda l: (0, 0)),               # final RMSNorm w
            pl.BlockSpec((1, 1, D), lambda l: (l, 0, 0)),         # ln1[l]
            pl.BlockSpec((1, D, 3 * inner), lambda l: (l, 0, 0)), # wqkv[l]
            pl.BlockSpec((1, inner, D), lambda l: (l, 0, 0)),     # wo[l]
            pl.BlockSpec((1, 1, D), lambda l: (l, 0, 0)),         # ln2[l]
            pl.BlockSpec((1, D, F), lambda l: (l, 0, 0)),         # wi[l]
            pl.BlockSpec((1, F, D), lambda l: (l, 0, 0)),         # wo_ff[l]
        ],
        out_specs=pl.BlockSpec((BS, D), lambda l: (0, 0)),        # resident hidden
        scratch_shapes=[
            pltpu.VMEM((H, S, S), jnp.float32),     # shared position bias
            pltpu.VMEM((BS, inner), jnp.float32),   # concatenated head contexts
        ],
        compiler_params=pltpu.CompilerParams(
            dimension_semantics=("arbitrary",)),
    )(emb_flat, mask_f, rel_t, lnf, ln1_all, wqkv_all, wo_all,
      ln2_all, wi_all, wof_all)


# --------------------------------------------------------------------------
# Forward wrapper
# --------------------------------------------------------------------------

def t5_encoder_forward(input_ids, attention_mask, params, cfg):
    """Returns last_hidden_state [B, S, d_model] (eval mode, no dropout)."""
    B, S = input_ids.shape
    D = params["emb"].shape[1]
    layers = params["layers"]

    emb_flat = _embed_rows(input_ids, params["emb"])                  # (B*S, D)

    # Stack per-layer weights on a leading layer axis; bf16 for MXU operands.
    ln1_all = jnp.stack([lp["ln1"] for lp in layers])                 # (L,1,D) f32
    ln2_all = jnp.stack([lp["ln2"] for lp in layers])                 # (L,1,D) f32
    wqkv_all = jnp.stack(
        [jnp.concatenate([lp["wq"], lp["wk"], lp["wv"]], axis=1)
         for lp in layers]).astype(jnp.bfloat16)                      # (L,D,3I)
    wo_all = jnp.stack([lp["wo"] for lp in layers]).astype(jnp.bfloat16)
    wi_all = jnp.stack([lp["wi"] for lp in layers]).astype(jnp.bfloat16)
    wof_all = jnp.stack([lp["wo_ff"] for lp in layers]).astype(jnp.bfloat16)
    rel_t = params["rel_bias"].T                                      # (H, NB)
    mask_f = attention_mask.astype(jnp.float32)                       # (B, S)

    out_flat = _encoder_stack(emb_flat, mask_f, rel_t, params["ln_f"],
                              ln1_all, wqkv_all, wo_all, ln2_all,
                              wi_all, wof_all, cfg["max_distance"])
    return out_flat.reshape(B, S, D)


# --------------------------------------------------------------------------
# Parameters and pure-JAX reference (f32)
# --------------------------------------------------------------------------

def _init_params(key, cfg):
    V, D, F, L = cfg["vocab"], cfg["d_model"], cfg["d_ff"], cfg["num_layers"]
    H, dh, NB = cfg["num_heads"], cfg["d_kv"], cfg["num_buckets"]
    inner = H * dh
    keys = iter(jax.random.split(key, 3 + 8 * L))
    scale = 0.05
    params = {
        "emb": jax.random.normal(next(keys), (V, D), jnp.float32),
        "rel_bias": jax.random.normal(next(keys), (NB, H), jnp.float32) * 0.5,
        "ln_f": 1.0 + 0.1 * jax.random.normal(next(keys), (1, D), jnp.float32),
        "layers": [],
    }
    for _ in range(L):
        params["layers"].append({
            "ln1": 1.0 + 0.1 * jax.random.normal(next(keys), (1, D), jnp.float32),
            "wq": jax.random.normal(next(keys), (D, inner), jnp.float32) * scale,
            "wk": jax.random.normal(next(keys), (D, inner), jnp.float32) * scale,
            "wv": jax.random.normal(next(keys), (D, inner), jnp.float32) * scale,
            "wo": jax.random.normal(next(keys), (inner, D), jnp.float32) * scale,
            "ln2": 1.0 + 0.1 * jax.random.normal(next(keys), (1, D), jnp.float32),
            "wi": jax.random.normal(next(keys), (D, F), jnp.float32) * scale,
            "wo_ff": jax.random.normal(next(keys), (F, D), jnp.float32) * scale,
        })
    return params


def _relative_position_bucket(relative_position, num_buckets, max_distance):
    """HF T5 bidirectional bucketing (numpy, used by the reference only)."""
    num_buckets //= 2
    rel_buckets = (relative_position > 0).astype(np.int32) * num_buckets
    n = np.abs(relative_position)
    max_exact = num_buckets // 2
    is_small = n < max_exact
    n_safe = np.maximum(n, 1).astype(np.float32)
    val_if_large = max_exact + (
        np.log(n_safe / max_exact) / np.log(max_distance / max_exact)
        * (num_buckets - max_exact)
    ).astype(np.int32)
    val_if_large = np.minimum(val_if_large, num_buckets - 1)
    rel_buckets = rel_buckets + np.where(is_small, n, val_if_large)
    return rel_buckets.astype(np.int32)


def _compute_buckets(S, num_buckets, max_distance):
    ctx = np.arange(S, dtype=np.int32)[:, None]
    mem = np.arange(S, dtype=np.int32)[None, :]
    return _relative_position_bucket(mem - ctx, num_buckets, max_distance)


def _rmsnorm_ref(x, w):
    var = jnp.mean(x * x, axis=-1, keepdims=True)
    return x * jax.lax.rsqrt(var + EPS) * w


def _reference_forward(input_ids, attention_mask, params, buckets, cfg):
    H, dh = cfg["num_heads"], cfg["d_kv"]
    inner = H * dh
    emb = params["emb"][input_ids]                               # (B,S,D)
    B, S, _ = emb.shape
    pos_bias = jnp.transpose(params["rel_bias"][jnp.asarray(buckets)],
                             (2, 0, 1))                          # (H,S,S)
    mask_bias = (1.0 - attention_mask.astype(jnp.float32)
                 )[:, None, None, :] * NEG_INF                   # (B,1,1,S)
    h = emb
    for lp in params["layers"]:
        xn = _rmsnorm_ref(h, lp["ln1"])
        q = (xn @ lp["wq"]).reshape(B, S, H, dh).transpose(0, 2, 1, 3)
        k = (xn @ lp["wk"]).reshape(B, S, H, dh).transpose(0, 2, 1, 3)
        v = (xn @ lp["wv"]).reshape(B, S, H, dh).transpose(0, 2, 1, 3)
        scores = jnp.einsum("bhqd,bhkd->bhqk", q, k) + pos_bias[None] + mask_bias
        p = jax.nn.softmax(scores, axis=-1)
        ctx = jnp.einsum("bhqk,bhkd->bhqd", p, v
                         ).transpose(0, 2, 1, 3).reshape(B, S, inner)
        h = h + ctx @ lp["wo"]
        xn = _rmsnorm_ref(h, lp["ln2"])
        h = h + jnp.maximum(xn @ lp["wi"], 0.0) @ lp["wo_ff"]
    return _rmsnorm_ref(h, params["ln_f"])


# --------------------------------------------------------------------------

if __name__ == "__main__":
    cfg = dict(vocab=256, d_model=128, d_ff=256, num_layers=2,
               num_heads=4, d_kv=32, num_buckets=32, max_distance=128)
    B, S = 2, 8

    key = jax.random.PRNGKey(0)
    k_param, k_ids = jax.random.split(key)
    params = _init_params(k_param, cfg)

    input_ids = jax.random.randint(k_ids, (B, S), 0, cfg["vocab"],
                                   dtype=jnp.int32)
    attention_mask = jnp.array([[1, 1, 1, 1, 1, 1, 1, 1],
                                [1, 1, 1, 1, 1, 0, 0, 0]], dtype=jnp.int32)

    out = t5_encoder_forward(input_ids, attention_mask, params, cfg)
    jax.block_until_ready(out)

    buckets = _compute_buckets(S, cfg["num_buckets"], cfg["max_distance"])
    ref = _reference_forward(input_ids, attention_mask, params, buckets, cfg)
    # Tolerance accounts for bf16 MXU operands (f32 accumulation) in the kernel
    # vs the pure-f32 reference.
    np.testing.assert_allclose(np.asarray(out), np.asarray(ref),
                               rtol=5e-2, atol=5e-2)

    print("KERNEL_OK")
</pallas_src>

<mosaic_0001>
module attributes {stable_mosaic.version = 11 : i64} {
  func.func @_embed_gather_kernel(%arg0: i32, %arg1: memref<16xi32, #tpu.memory_space<smem>>, %arg2: memref<256x128xf32, #tpu.memory_space<any>>, %arg3: memref<16x128xf32, #tpu.memory_space<vmem>>, %arg4: memref<16x128xf32, #tpu.memory_space<vmem>>, %arg5: memref<!tpu.dma_semaphore, #tpu.memory_space<semaphore_mem>>) attributes {dimension_semantics = [#tpu.dimension_semantics<arbitrary>], iteration_bounds = array<i64: 1>, scalar_prefetch = 1 : i64, scratch_operands = 2 : i64, tpu.core_type = #tpu.core_type<tc>, window_params = [{}, {pipeline_mode = #tpu.pipeline_mode<synchronous>, transform_indices = @transform_1, window_bounds = array<i64: 16, 128>}]} {
    %c0_i32 = arith.constant 0 : i32
    %c16_i32 = arith.constant 16 : i32
    %0 = arith.addi %c0_i32, %c16_i32 : i32
    %c1_i32 = arith.constant 1 : i32
    scf.for %arg6 = %c0_i32 to %0 step %c1_i32  : i32 {
      %4 = arith.index_cast %arg6 : i32 to index
      %5 = memref.load %arg1[%4] : memref<16xi32, #tpu.memory_space<smem>>
      %c0_i32_8 = arith.constant 0 : i32
      %6 = tpu.memref_slice %arg2[%5, %c0_i32_8] : memref<256x128xf32, #tpu.memory_space<any>> -> memref<1x128xf32, #tpu.memory_space<any>>
      %7 = tpu.memref_squeeze %6 : memref<1x128xf32, #tpu.memory_space<any>> -> memref<128xf32, #tpu.memory_space<any>>
      %c0_i32_9 = arith.constant 0 : i32
      %8 = tpu.memref_slice %arg4[%arg6, %c0_i32_9] : memref<16x128xf32, #tpu.memory_space<vmem>> -> memref<1x128xf32, #tpu.memory_space<vmem>>
      %9 = tpu.memref_squeeze %8 : memref<1x128xf32, #tpu.memory_space<vmem>> -> memref<128xf32, #tpu.memory_space<vmem>>
      tpu.enqueue_dma source(%7 : memref<128xf32, #tpu.memory_space<any>>) target(%9 : memref<128xf32, #tpu.memory_space<vmem>>) target_semaphore(%arg5 : memref<!tpu.dma_semaphore, #tpu.memory_space<semaphore_mem>>)
    }
    %c16_i32_0 = arith.constant 16 : i32
    %c0_i32_1 = arith.constant 0 : i32
    %c16_i32_2 = arith.constant 16 : i32
    %1 = arith.addi %c0_i32_1, %c16_i32_2 : i32
    %c1_i32_3 = arith.constant 1 : i32
    scf.for %arg6 = %c0_i32_1 to %1 step %c1_i32_3  : i32 {
      %4 = arith.index_cast %arg6 : i32 to index
      %5 = memref.load %arg1[%4] : memref<16xi32, #tpu.memory_space<smem>>
      %c0_i32_8 = arith.constant 0 : i32
      %6 = tpu.memref_slice %arg2[%5, %c0_i32_8] : memref<256x128xf32, #tpu.memory_space<any>> -> memref<1x128xf32, #tpu.memory_space<any>>
      %7 = tpu.memref_squeeze %6 : memref<1x128xf32, #tpu.memory_space<any>> -> memref<128xf32, #tpu.memory_space<any>>
      %c0_i32_9 = arith.constant 0 : i32
      %8 = tpu.memref_slice %arg4[%arg6, %c0_i32_9] : memref<16x128xf32, #tpu.memory_space<vmem>> -> memref<1x128xf32, #tpu.memory_space<vmem>>
      %9 = tpu.memref_squeeze %8 : memref<1x128xf32, #tpu.memory_space<vmem>> -> memref<128xf32, #tpu.memory_space<vmem>>
      tpu.wait_dma2 semaphore(%arg5 : memref<!tpu.dma_semaphore, #tpu.memory_space<semaphore_mem>>) src(%7 : memref<128xf32, #tpu.memory_space<any>>) dst(%9 : memref<128xf32, #tpu.memory_space<vmem>>)
    }
    %c16_i32_4 = arith.constant 16 : i32
    %c0 = arith.constant 0 : index
    %c0_5 = arith.constant 0 : index
    %2 = vector.load %arg4[%c0, %c0_5] : memref<16x128xf32, #tpu.memory_space<vmem>>, vector<16x128xf32>
    %c0_6 = arith.constant 0 : index
    %c0_7 = arith.constant 0 : index
    %3 = vector.load %arg3[%c0_6, %c0_7] : memref<16x128xf32, #tpu.memory_space<vmem>>, vector<16x128xf32>
    tpu.vector_store %arg3[%c0_6, %c0_7], %2 {strides = array<i32>} : memref<16x128xf32, #tpu.memory_space<vmem>>, vector<16x128xf32>,
    return
  }
  func.func @transform_1(%arg0: i32, %arg1: memref<16xi32, #tpu.memory_space<smem>>) -> (i32, i32) {
    %c0_i32 = arith.constant 0 : i32
    %c0_i32_0 = arith.constant 0 : i32
    %c0_i32_1 = arith.constant 0 : i32
    return %c0_i32, %c0_i32_0 : i32, i32
  }
}

</mosaic_0001>

<bundles_post_ra>
// kernel: tpu_custom_call.1
= control target key start
LH: loop header
LB: loop body
LE: loop exit
PB: predicated region body
PF: predicated region fallthrough
CT: control target
= control target key end

     0   :  { %s244_s0 = inlined_call_operand.hbm [shape: s32[16], index: 0, kind: input, shape index: {}]   ;;  %s245_s1 = inlined_call_operand.hbm [shape: f32[256,128], index: 1, kind: input, shape index: {}]   ;;  %s246_s2 = inlined_call_operand.hbm [shape: f32[16,128], index: 2, kind: output, shape index: {}]  }
   0x1   :  { %s103_s11 = scalar_lea.hbm %s244_s0, 16 }
   0x2   :  { %p104_p0 = scmp.ne.s32.totalorder %s244_s0, %s103_s11  ;;  %p107_p1 = scmp.lt.u32.totalorder %s103_s11, %s244_s0 }
   0x4   :  { %p109_p2 = pnand %p107_p1, %p104_p0 }
   0x6   :  { %112 = shalt.err (!%p109_p2)  }
   0x7   :  { %s181_s16 = smov [#allocation5]  }
   0x8   :  { %8 = dma.hbm_to_smem %s244_s0, 16, %s181_s16, [#allocation4] }
   0x9   :  { %167 = dma.done.wait [#allocation4], 16 }
   0xa   :  { %168 = vsyncadd [#allocation4], 4294967280 }
   0xb   :  { %10 = sfence }
   0xc   :  { %11 = vsyncpa [#allocation7], 0  ;;  %s213_s19 = smov 0  }
   0xd LB: > { %s18_s20 = sld [smem:[#allocation5 + %s175_s19]]  ;;  %s21_s21 = scalar_lea.vmem [#allocation2], %s175_s19  ;;  %s175_s19 = sphi %s213_s19, %s17_s19  }
   0xe   : > { %s29_s22 = sshll.u32 %s21_s21, 4  ;;  %s115_s29 = scalar_lea.hbm %s245_s1, 4096  ;;  %s30_s22 = int_to_ptr.vmem [resolvable:$true] %s29_s22 }
  0x13   : > { %s81_s23 = sshll.u32 %s18_s20, 4 }
  0x14   : > { %s20_s25 = scalar_lea.hbm %s245_s1, %s81_s23 }
  0x15   : > { %s113_s26 = scalar_lea.hbm %s20_s25, 16  ;;  %p116_p4 = scmp.lt.u32.totalorder %s20_s25, %s245_s1 }
  0x16   : > { %p114_p3 = scmp.ne.s32.totalorder %s20_s25, %s113_s26  ;;  %p117_p5 = scmp.lt.u32.totalorder %s115_s29, %s113_s26 }
  0x17   : > { %p119_p7 = scmp.lt.u32.totalorder %s113_s26, %s20_s25 }
  0x18   : > { %p118_p6 = por %p117_p5, %p116_p4 }
  0x1a   : > { %p120_p8 = por %p119_p7, %p118_p6 }
  0x1c   : > { %p121_p9 = pnand %p120_p8, %p114_p3 }
  0x1e   : > { %124 = shalt.err (!%p121_p9)  }
  0x1f   : > { %s125_s4 = scalar_lea.vmem %s30_s22, 16  ;;  %s182_s5 = smov [#allocation2]  }
  0x20   : > { %p126_p10 = scmp.ne.s32.totalorder %s30_s22, %s125_s4  ;;  %s127_s6 = sshll.u32 %s182_s5, 4  ;;  %s128_s6 = int_to_ptr.vmem [resolvable:$false] %s127_s6 }
  0x21   : > { %s129_s7 = scalar_lea.vmem %s128_s6, 256  ;;  %p130_p11 = scmp.lt.s32.totalorder %s30_s22, %s128_s6 }
  0x22   : > { %p131_p12 = scmp.lt.s32.totalorder %s129_s7, %s125_s4 }
  0x24   : > { %p132_p13 = por %p131_p12, %p130_p11 }
  0x26   : > { %p133_p0 = pnand %p132_p13, %p126_p10 }
  0x28   : > { %136 = shalt.err (!%p133_p0)  }
  0x29   : > { %32 = dma.hbm_to_vmem [thread:$0]  %s20_s25, 16, %s30_s22, [#allocation3] }
  0x2a   : > { %s17_s19 = sadd.s32 1, %s175_s19  }
  0x2b   : > { %p14_p1 = scmp.ge.s32.totalorder %s17_s19, 16  }
  0x2c   :  { %s177_s8 = smov (%p14_p1), 0  }
  0x2d   :  { %16 = sbr.rel (!%p14_p1) target bundleno = 13 (0xd), region = 40 }
  0x34 LB: > { %169 = dma.done.wait [#allocation3], 16  ;;  %s179_s8 = sphi %s177_s8, %s38_s8  }
  0x35   : > { %170 = vsyncadd [#allocation3], 4294967280  ;;  %s38_s8 = sadd.s32 1, %s179_s8  }
  0x36   : > { %p35_p2 = scmp.ge.s32.totalorder %s38_s8, 16  }
  0x37   :  { %v42_v0 = vld [vmem:[#allocation2] sm:$0xff] (%p35_p2)  ;;  %v43_v1 = vld [vmem:[#allocation2 + $0x8] sm:$0xff] (%p35_p2)  ;;  %s183_s9 = smov (%p35_p2), [#allocation6]  }
  0x38   :  { %37 = sbr.rel (!%p35_p2) target bundleno = 52 (0x34), region = 51  ;;  %44 = vst [vmem:[#allocation6] sm:$0xff] (%p35_p2), %v42_v0  ;;  %45 = vst [vmem:[#allocation6 + $0x8] sm:$0xff] (%p35_p2), %v43_v1  ;;  %s51_s10 = sshll.u32 (%p35_p2), %s183_s9, 4  ;;  %s52_s10 = int_to_ptr.vmem [resolvable:$true] %s51_s10 }
  0x39   :  { %s137_s11 = scalar_lea.vmem (%p35_p2), %s52_s10, 256  ;;  %p142_p4 = scmp.lt.s32.totalorder (%p35_p2), %s52_s10, %s52_s10 }
  0x3a   :  { %p138_p3 = scmp.ne.s32.totalorder (%p35_p2), %s52_s10, %s137_s11  ;;  %p143_p5 = scmp.lt.s32.totalorder (%p35_p2), %s137_s11, %s137_s11 }
  0x3c   :  { %p144_p6 = por (%p35_p2), %p143_p5, %p142_p4 }
  0x3e   :  { %p145_p7 = pnand (%p35_p2), %p144_p6, %p138_p3 }
  0x40   :  { %148 = shalt.err (!%p145_p7)
}
  0x41   :  { %s149_s13 = scalar_lea.hbm %s246_s2, 256 }
  0x42   :  { %p150_p8 = scmp.ne.s32.totalorder %s246_s2, %s149_s13  ;;  %p153_p9 = scmp.lt.u32.totalorder %s149_s13, %s246_s2 }
  0x44   :  { %p155_p10 = pnand %p153_p9, %p150_p8 }
  0x46   :  { %158 = shalt.err (!%p155_p10)
}
  0x47   :  { %s184_s18 = smov 128   ;;  %s185_s19 = smov 8  }
  0x48   :  { %57 = dma.vmem_to_hbm [thread:$0]  %s52_s10, 256, %s246_s2, [#allocation7], %s184_s18, %s184_s18, %s185_s19  }
  0x49   :  { %171 = dma.done.wait [#allocation7], 256  }
  0x4a   :  { %172 = vsyncadd [#allocation7], 4294967040 }
  0x4b   :  { %61 = vsyncpa [#allocation7], 1 }
  0x4c   :  { %62 = vsyncmov [#allocation3] }
  0x4f   :  { %s63_s22 = vpop.sfrf %62 }
  0x50   :  { %p82_p11 = scmp.ne.s32.totalorder %s63_s22, 0 }
  0x52   :  { %67 = shalt.err (%p82_p11)  }

</bundles_post_ra>
